<compile_context>
chip_gen: v5e
topology: v5e:2x2
jax: 0.10.0
libtpu: 0.0.40
codegen_flags: <defaults>
</compile_context>

<pallas_src>
import functools

import jax
import jax.numpy as jnp
from jax.experimental import pallas as pl
from jax.experimental.pallas import tpu as pltpu


def _round_up(v, m):
    return ((v + m - 1) // m) * m


def _mosaiks1d_kernel(x_ref, w_ref, o_ref, *, ks, time_chunk):
    """Fused Conv1d (valid, no bias) + ReLU + mean over time for one batch tile.

    x_ref: [TB, T, C]     input tile (full time axis, full channels)   (VMEM)
    w_ref: [ks*C, Kp]     folded conv weight, w[j*C + c, k] = w_pt[k, c, j]
    o_ref: [TB, Kp]       per-batch-row mean of relu(conv)             (VMEM)
    """
    TB, T, C = x_ref.shape
    ksC, Kp = w_ref.shape
    T_out = T - ks + 1

    w = w_ref[...]  # resident folded weight, loaded once

    def chunk_relu_sum(t0, tlen):
        # im2col for `tlen` output positions: concatenate the ks shifted tap
        # slices along channels -> [TB, tlen, ks*C], then ONE folded-tap MXU
        # matmul (contraction dim ks*C) with f32 accumulation.
        parts = [x_ref[:, pl.ds(t0 + j, tlen), :] for j in range(ks)]
        window = jnp.concatenate(parts, axis=2)
        # tlen is a multiple of 8 on the hot path, so this leading-dim merge
        # reshape is layout-preserving (no relayout copy).
        y = jnp.dot(window.reshape(TB * tlen, ksC), w,
                    preferred_element_type=jnp.float32)          # [TB*tlen, Kp]
        y = jnp.maximum(y, 0.0).reshape(TB, tlen, Kp)
        return jnp.sum(y, axis=1)                                # [TB, Kp]

    n_full = T_out // time_chunk
    rem = T_out - n_full * time_chunk

    total = jnp.zeros((TB, Kp), jnp.float32)
    if 0 < n_full <= 4:
        # Short static trip count: unroll with static offsets (LLO visibility).
        for i in range(n_full):
            total = total + chunk_relu_sum(i * time_chunk, time_chunk)
    elif n_full > 4:
        # Long T: a visible loop bounds vreg live ranges / body size.
        def body(i, tot):
            t0 = pl.multiple_of(i * time_chunk, time_chunk)
            return tot + chunk_relu_sum(t0, time_chunk)
        total = jax.lax.fori_loop(0, n_full, body, total)
    if rem > 0:
        total = total + chunk_relu_sum(n_full * time_chunk, rem)

    o_ref[...] = (total * (1.0 / float(T_out))).astype(o_ref.dtype)


def mosaiks1d_forward(x, weight_ptorch, *, batch_tile=128, time_chunk=None,
                      compute_dtype=jnp.float32):
    """x: [B, T, C] (pre-rearrange PyTorch layout); weight_ptorch: [K, C, ks].

    Returns [B, K] = relu(conv1d(x^T, w)).mean(time), matching Mosaiks1d.forward.
    Use compute_dtype=jnp.bfloat16 for production shapes (HBM-bandwidth bound);
    accumulation and output stay f32.
    """
    B, T, C = x.shape
    K, C_w, ks = weight_ptorch.shape
    assert C_w == C, (C_w, C)
    assert T >= ks, "need timestep >= kernel_size for a 'valid' Conv1d"
    T_out = T - ks + 1

    itemsize = jnp.dtype(compute_dtype).itemsize
    Kp = _round_up(K, 128)          # lane-dense output / MXU N dimension
    ksC = ks * C

    # ---- folded weight: [ks*C, Kp] with w_f[j*C + c, k] = w_pt[k, c, j] -----
    w_f = jnp.transpose(weight_ptorch, (2, 1, 0)).reshape(ksC, K)
    w_f = w_f.astype(compute_dtype)
    if Kp != K:
        w_f = jnp.pad(w_f, ((0, 0), (0, Kp - K)))

    # ---- batch tile: as large as a v7x-safe VMEM budget allows --------------
    X_TILE_BUDGET = 24 << 20                       # double-buffered x tiles
    tb_vmem = (X_TILE_BUDGET // (2 * T * C * itemsize)) // 8 * 8
    # TODO(synk): for very long T (tb_vmem < 8) add a time grid axis with a
    # ks-1 halo instead of loading the full [TB, T, C] tile per step.
    TB = max(8, min(_round_up(batch_tile, 8), max(tb_vmem, 8)))
    if B <= TB:
        if B > 8:
            # keep >= 2 grid steps so both v7x TensorCores get work
            TB = max(8, min(TB, _round_up(-(-B // 2), 8)))
        else:
            TB = 8
    Bp = _round_up(B, TB)
    grid_b = Bp // TB

    # ---- time chunk: keep live window/matmul/ReLU intermediates small -------
    if time_chunk is None:
        time_chunk = max(8, (1024 // TB) // 8 * 8)   # ~1024 matmul rows per chunk
    tc = min(time_chunk, T_out)
    if tc >= 8:
        tc = (tc // 8) * 8                           # multiple of 8 -> cheap reshapes
    tc = max(1, tc)

    xk = x.astype(compute_dtype)
    if Bp != B:
        xk = jnp.pad(xk, ((0, Bp - B), (0, 0), (0, 0)))

    vmem_bytes = int(2 * TB * T * C * itemsize       # double-buffered x tiles
                     + 2 * ksC * Kp * itemsize       # resident folded weight
                     + 2 * TB * Kp * 4               # output tiles
                     + TB * tc * (ksC + Kp) * 4      # im2col window + matmul result
                     + (4 << 20))                    # compiler scratch headroom
    vmem_bytes = min(max(vmem_bytes, 16 << 20), 56 << 20)   # safe on 64 MiB v7x

    cost = pl.CostEstimate(
        flops=2 * B * T_out * ksC * K,
        transcendentals=0,
        bytes_accessed=int(B * T * C * itemsize + ksC * K * itemsize + B * K * 4),
    )

    kernel = functools.partial(_mosaiks1d_kernel, ks=ks, time_chunk=tc)
    out = pl.pallas_call(
        kernel,
        out_shape=jax.ShapeDtypeStruct((Bp, Kp), jnp.float32),
        grid_spec=pltpu.PrefetchScalarGridSpec(
            num_scalar_prefetch=0,
            grid=(grid_b,),
            in_specs=[
                pl.BlockSpec((TB, T, C), lambda b: (b, 0, 0)),
                pl.BlockSpec((ksC, Kp), lambda b: (0, 0)),
            ],
            out_specs=pl.BlockSpec((TB, Kp), lambda b: (b, 0)),
        ),
        compiler_params=pltpu.CompilerParams(
            dimension_semantics=("parallel",),       # lets v7x split batch over 2 TCs
            vmem_limit_bytes=vmem_bytes,
        ),
        cost_estimate=cost,
    )(xk, w_f)

    return out[:B, :K]


def mosaiks1d_reference(x, weight_ptorch):
    """Plain-JAX reference mirroring the PyTorch forward exactly."""
    K, C, ks = weight_ptorch.shape
    B, T, _ = x.shape
    T_out = T - ks + 1
    acc = jnp.zeros((B, T_out, K), jnp.float32)
    for j in range(ks):
        # conv1d: out[b,k,t] = sum_{c,j} x[b, t+j, c] * w[k, c, j]
        acc = acc + jnp.einsum("btc,kc->btk", x[:, j:j + T_out, :],
                               weight_ptorch[:, :, j])
    return jnp.maximum(acc, 0.0).mean(axis=1)


if __name__ == "__main__":
    # Small shapes consistent with the module: batch=2, timestep=16,
    # in_channels=4, k (out channels)=32, kernel_size=3.
    B, T, C, K, ks = 2, 16, 4, 32, 3

    key = jax.random.PRNGKey(0)
    kx, kw, kx2 = jax.random.split(key, 3)
    x = jax.random.normal(kx, (B, T, C), dtype=jnp.float32)
    # PyTorch Conv1d weight layout [K, C, ks] ("patches"-style init).
    weight = jax.random.normal(kw, (K, C, ks), dtype=jnp.float32) * 0.1

    out = jax.block_until_ready(mosaiks1d_forward(x, weight))
    ref = mosaiks1d_reference(x, weight)
    assert out.shape == (B, K)
    assert jnp.allclose(out, ref, atol=1e-5, rtol=1e-5), "mismatch vs reference"

    # Second check: batch larger than one tile (exercises the 2-step grid,
    # batch padding and pipelining).
    B2 = 20
    x2 = jax.random.normal(kx2, (B2, T, C), dtype=jnp.float32)
    out2 = jax.block_until_ready(mosaiks1d_forward(x2, weight))
    ref2 = mosaiks1d_reference(x2, weight)
    assert out2.shape == (B2, K)
    assert jnp.allclose(out2, ref2, atol=1e-5, rtol=1e-5), "mismatch (tiled batch)"

    # Third check: bf16 production path (f32 accumulation; loose tolerances).
    out3 = jax.block_until_ready(
        mosaiks1d_forward(x2, weight, compute_dtype=jnp.bfloat16))
    assert out3.shape == (B2, K)
    assert jnp.allclose(out3, ref2, atol=3e-2, rtol=3e-2), "mismatch (bf16 path)"

    print("KERNEL_OK")
</pallas_src>

<mosaic_0001>
module attributes {stable_mosaic.version = 11 : i64} {
  func.func @_mosaiks1d_kernel(%arg0: i32, %arg1: memref<8x16x4xf32, #tpu.memory_space<vmem>>, %arg2: memref<12x128xf32, #tpu.memory_space<vmem>>, %arg3: memref<8x128xf32, #tpu.memory_space<vmem>>) attributes {dimension_semantics = [#tpu.dimension_semantics<parallel>], iteration_bounds = array<i64: 1>, scalar_prefetch = 0 : i64, scratch_operands = 0 : i64, tpu.core_type = #tpu.core_type<tc>, window_params = [{transform_indices = @transform_0, window_bounds = array<i64: 8, 16, 4>}, {pipeline_mode = #tpu.pipeline_mode<synchronous>, transform_indices = @transform_1, window_bounds = array<i64: 12, 128>}, {transform_indices = @transform_2, window_bounds = array<i64: 8, 128>}]} {
    %c0 = arith.constant 0 : index
    %c0_0 = arith.constant 0 : index
    %0 = vector.load %arg2[%c0, %c0_0] : memref<12x128xf32, #tpu.memory_space<vmem>>, vector<12x128xf32>
    %cst = arith.constant 0.000000e+00 : f32
    %1 = vector.broadcast %cst : f32 to vector<8x128xf32>
    %c0_1 = arith.constant 0 : index
    %c0_2 = arith.constant 0 : index
    %c0_3 = arith.constant 0 : index
    %2 = vector.load %arg1[%c0_1, %c0_2, %c0_3] : memref<8x16x4xf32, #tpu.memory_space<vmem>>, vector<8x8x4xf32>
    %c0_4 = arith.constant 0 : index
    %c1 = arith.constant 1 : index
    %c0_5 = arith.constant 0 : index
    %3 = vector.load %arg1[%c0_4, %c1, %c0_5] : memref<8x16x4xf32, #tpu.memory_space<vmem>>, vector<8x8x4xf32>
    %c0_6 = arith.constant 0 : index
    %c2 = arith.constant 2 : index
    %c0_7 = arith.constant 0 : index
    %4 = vector.load %arg1[%c0_6, %c2, %c0_7] : memref<8x16x4xf32, #tpu.memory_space<vmem>>, vector<8x8x4xf32>
    %5 = tpu.concatenate %2, %3, %4 in 2 : vector<8x8x4xf32>, vector<8x8x4xf32>, vector<8x8x4xf32> -> vector<8x8x12xf32>
    %6 = vector.shape_cast %5 : vector<8x8x12xf32> to vector<64x12xf32>
    %cst_8 = arith.constant dense<0.000000e+00> : vector<64x128xf32>
    %7 = tpu.matmul %6, %0, %cst_8 {dimension_numbers = #tpu.dot_dimension_numbers<[1], [0], [0], [1], [0, 0, 1, 1], [], []>} : vector<64x12xf32>, vector<12x128xf32>, vector<64x128xf32> -> vector<64x128xf32>
    %cst_9 = arith.constant 0.000000e+00 : f32
    %8 = vector.broadcast %cst_9 : f32 to vector<64x128xf32>
    %9 = arith.maximumf %7, %8 : vector<64x128xf32>
    %10 = vector.shape_cast %9 : vector<64x128xf32> to vector<8x8x128xf32>
    %cst_10 = arith.constant dense<0.000000e+00> : vector<8x128xf32>
    %11 = vector.multi_reduction <add>, %10, %cst_10 [1] : vector<8x8x128xf32> to vector<8x128xf32>
    %12 = arith.addf %1, %11 : vector<8x128xf32>
    %c0_11 = arith.constant 0 : index
    %c8 = arith.constant 8 : index
    %c0_12 = arith.constant 0 : index
    %13 = vector.load %arg1[%c0_11, %c8, %c0_12] : memref<8x16x4xf32, #tpu.memory_space<vmem>>, vector<8x6x4xf32>
    %c0_13 = arith.constant 0 : index
    %c9 = arith.constant 9 : index
    %c0_14 = arith.constant 0 : index
    %14 = vector.load %arg1[%c0_13, %c9, %c0_14] : memref<8x16x4xf32, #tpu.memory_space<vmem>>, vector<8x6x4xf32>
    %c0_15 = arith.constant 0 : index
    %c10 = arith.constant 10 : index
    %c0_16 = arith.constant 0 : index
    %15 = vector.load %arg1[%c0_15, %c10, %c0_16] : memref<8x16x4xf32, #tpu.memory_space<vmem>>, vector<8x6x4xf32>
    %16 = tpu.concatenate %13, %14, %15 in 2 : vector<8x6x4xf32>, vector<8x6x4xf32>, vector<8x6x4xf32> -> vector<8x6x12xf32>
    %17 = vector.shape_cast %16 : vector<8x6x12xf32> to vector<48x12xf32>
    %cst_17 = arith.constant dense<0.000000e+00> : vector<48x128xf32>
    %18 = tpu.matmul %17, %0, %cst_17 {dimension_numbers = #tpu.dot_dimension_numbers<[1], [0], [0], [1], [0, 0, 1, 1], [], []>} : vector<48x12xf32>, vector<12x128xf32>, vector<48x128xf32> -> vector<48x128xf32>
    %cst_18 = arith.constant 0.000000e+00 : f32
    %19 = vector.broadcast %cst_18 : f32 to vector<48x128xf32>
    %20 = arith.maximumf %18, %19 : vector<48x128xf32>
    %21 = vector.shape_cast %20 : vector<48x128xf32> to vector<8x6x128xf32>
    %cst_19 = arith.constant dense<0.000000e+00> : vector<8x128xf32>
    %22 = vector.multi_reduction <add>, %21, %cst_19 [1] : vector<8x6x128xf32> to vector<8x128xf32>
    %23 = arith.addf %12, %22 : vector<8x128xf32>
    %cst_20 = arith.constant 0.0714285746 : f32
    %24 = vector.broadcast %cst_20 : f32 to vector<8x128xf32>
    %25 = arith.mulf %23, %24 : vector<8x128xf32>
    %c0_21 = arith.constant 0 : index
    %c0_22 = arith.constant 0 : index
    %26 = vector.load %arg3[%c0_21, %c0_22] : memref<8x128xf32, #tpu.memory_space<vmem>>, vector<8x128xf32>
    tpu.vector_store %arg3[%c0_21, %c0_22], %25 {strides = array<i32>} : memref<8x128xf32, #tpu.memory_space<vmem>>, vector<8x128xf32>,
    return
  }
  func.func @transform_0(%arg0: i32) -> (i32, i32, i32) {
    %c0_i32 = arith.constant 0 : i32
    %c0_i32_0 = arith.constant 0 : i32
    %c0_i32_1 = arith.constant 0 : i32
    return %arg0, %c0_i32, %c0_i32_0 : i32, i32, i32
  }
  func.func @transform_1(%arg0: i32) -> (i32, i32) {
    %c0_i32 = arith.constant 0 : i32
    %c0_i32_0 = arith.constant 0 : i32
    %c0_i32_1 = arith.constant 0 : i32
    return %c0_i32, %c0_i32_0 : i32, i32
  }
  func.func @transform_2(%arg0: i32) -> (i32, i32) {
    %c0_i32 = arith.constant 0 : i32
    %c0_i32_0 = arith.constant 0 : i32
    return %arg0, %c0_i32 : i32, i32
  }
}

</mosaic_0001>

<bundles_post_ra>
// kernel: tpu_custom_call.1
= control target key start
LH: loop header
LB: loop body
LE: loop exit
PB: predicated region body
PF: predicated region fallthrough
CT: control target
= control target key end

     0   :  { %s703_s13 = smov 4   ;;  %s964_s0 = inlined_call_operand.vmem [shape: f32[8,16,4], index: 0, kind: input, shape index: {}]   ;;  %s965_s1 = inlined_call_operand.vmem [shape: f32[12,128], index: 1, kind: input, shape index: {}]   ;;  %s966_s2 = inlined_call_operand.hbm [shape: f32[8,128], index: 2, kind: output, shape index: {}]  }
   0x1   :  { %v263_v0 = vld [vmem:[%s964_s0 + $0x19] sm:$0x3f]  ;;  %v262_v1 = vld [vmem:[%s964_s0 + $0x9] sm:$0x3f] }
   0x2   :  { %288 = vrot.lane.b32.xlu1 %v263_v0, %s703_s13  ;;  %286 = vrot.lane.b32.xlu0 %v262_v1, %s703_s13  ;;  %v264_v2 = vld [vmem:[%s964_s0 + $0x29] sm:$0x3f] }
   0x3   :  { %290 = vrot.lane.b32.xlu2 %v264_v2, %s703_s13 }
   0x4   :  { %7 = vsyncpa [#allocation3], 0  ;;  %v271_v3 = vld [vmem:[%s964_s0 + $0x1a] sm:$0x3f]  ;;  %v270_v4 = vld [vmem:[%s964_s0 + $0xa] sm:$0x3f] }
   0x5   :  { %v272_v5 = vld [vmem:[%s964_s0 + $0x2a] sm:$0x3f]  ;;  %s704_s22 = smov 8   ;;  %v273_v6 = vld [vmem:[%s964_s0 + $0x3a] sm:$0x3f]  ;;  %v26_v14 = vld [vmem:[%s964_s0 + $0x41] sm:$0xff] }
   0x6   :  { %v265_v7 = vld [vmem:[%s964_s0 + $0x39] sm:$0x3f]  ;;  %v266_v8 = vld [vmem:[%s964_s0 + $0x49] sm:$0x3f]  ;;  %v22_v16 = vld [vmem:[%s964_s0 + $0x1] sm:$0xff]  ;;  %vm102_vm0 = vcmask 31744  }
   0x7   :  { %v268_v9 = vld [vmem:[%s964_s0 + $0x69] sm:$0x3f]  ;;  %v267_v10 = vld [vmem:[%s964_s0 + $0x59] sm:$0x3f]  ;;  %v27_v20 = vld [vmem:[%s964_s0 + $0x51] sm:$0xff]  ;;  %vm111_vm1 = vcmask 64512  }
   0x8   :  { %v274_v11 = vld [vmem:[%s964_s0 + $0x4a] sm:$0x3f]  ;;  %v275_v13 = vld [vmem:[%s964_s0 + $0x5a] sm:$0x3f]  ;;  %v34_v15 = vld [vmem:[%s964_s0 + $0x42] sm:$0xff]  ;;  %vm145_vm2 = vcmask 1043456  }
   0x9   :  { %v276_v12 = vld [vmem:[%s964_s0 + $0x6a] sm:$0x3f]  ;;  %v30_v17 = vld [vmem:[%s964_s0 + $0x2] sm:$0xff]  ;;  %v269_v18 = vld [vmem:[%s964_s0 + $0x79] sm:$0x3f]  ;;  %vm120_vm3 = vcmask 97280  }
   0xa   :  { %320 = vrot.lane.b32.xlu1 %v271_v3, %s704_s22  ;;  %318 = vrot.lane.b32.xlu0 %v270_v4, %s704_s22  ;;  %v277_v19 = vld [vmem:[%s964_s0 + $0x7a] sm:$0x3f]  ;;  %v35_v21 = vld [vmem:[%s964_s0 + $0x52] sm:$0xff]  ;;  %vm541_vm4 = vcmask 1045504   ;;  %vm622_vm5 = vcmask 1041409   ;;  %vm624_vm6 = vcmask 1042434  }
   0xb   :  { %322 = vrot.lane.b32.xlu2 %v272_v5, %s704_s22  ;;  %v23_v22 = vld [vmem:[%s964_s0 + $0x11] sm:$0xff]  ;;  %v28_v24 = vld [vmem:[%s964_s0 + $0x61] sm:$0xff]  ;;  %vm626_vm7 = vcmask 1043459   ;;  %vm628_vm8 = vcmask 1044484   ;;  %vm630_vm9 = vcmask 1045509   ;;  %vm632_vm10 = vcmask 1046534  }
   0xc   :  { %v31_v23 = vld [vmem:[%s964_s0 + $0x12] sm:$0xff]  ;;  %v36_v25 = vld [vmem:[%s964_s0 + $0x62] sm:$0xff]  ;;  %vm634_vm11 = vcmask 1047559  }
   0xd   :  { %v24_v26 = vld [vmem:[%s964_s0 + $0x21] sm:$0xff]  ;;  %v29_v28 = vld [vmem:[%s964_s0 + $0x71] sm:$0xff] }
   0xe   :  { %v32_v27 = vld [vmem:[%s964_s0 + $0x22] sm:$0xff]  ;;  %v37_v29 = vld [vmem:[%s964_s0 + $0x72] sm:$0xff] }
   0xf   :  { %v25_v30 = vld [vmem:[%s964_s0 + $0x31] sm:$0xff]  ;;  %v256_v33 = vld [vmem:[%s964_s0 + $0x28] sm:$0x3f]  ;;  %v12_v39 = vld [vmem:[%s965_s1] sm:$0xff] }
  0x10   :  { %v33_v31 = vld [vmem:[%s964_s0 + $0x32] sm:$0xff]  ;;  %v13_v38 = vld [vmem:[%s965_s1 + $0x8] sm:$0xf]  ;;  %s645_s1 = sshll.u32 %s966_s2, 4  ;;  %s646_s1 = int_to_ptr.hbm [resolvable:$true] %s645_s1 }
  0x11   :  { %663 = vmatpush.msk.msra.mxu1 %vm145_vm2, %v13_v38  ;;  %670 = vmatpush.msk.msra.mxu2 %vm145_vm2, %v13_v38  ;;  %v255_v43 = vld [vmem:[%s964_s0 + $0x18] sm:$0x3f]  ;;  %v254_v44 = vld [vmem:[%s964_s0 + $0x8] sm:$0x3f] }
  0x12   :  { %324 = vrot.lane.b32.xlu1 %v273_v6, %s704_s22  ;;  %292 = vrot.lane.b32.xlu0 %v265_v7, %s703_s13  ;;  %v258_v51 = vld [vmem:[%s964_s0 + $0x48] sm:$0x3f]  ;;  %v257_v58 = vld [vmem:[%s964_s0 + $0x38] sm:$0x3f] }
  0x13   :  { %294 = vrot.lane.b32.xlu2 %v266_v8, %s703_s13  ;;  %654 = vmatpush.msk.msra.mxu0 %vm145_vm2, %v13_v38 }
  0x14   :  { %672 = vmatpush.msk.msra.mxu3 %vm145_vm2, %v13_v38  ;;  %446 = vmatpush.msra.mxu1 %v12_v39 }
  0x15   :  { %671 = vmatpush.msra.mxu2 %v12_v39  ;;  %164 = vmatpush.msra.mxu0 %v12_v39 }
  0x16   :  { %673 = vmatpush.msra.mxu3 %v12_v39 }
  0x1a   :  { %298 = vrot.lane.b32.xlu1 %v268_v9, %s703_s13  ;;  %296 = vrot.lane.b32.xlu0 %v267_v10, %s703_s13  ;;  %v260_v10 = vld [vmem:[%s964_s0 + $0x68] sm:$0x3f] }
  0x1b   :  { %326 = vrot.lane.b32.xlu2 %v274_v11, %s704_s22  ;;  %v259_v11 = vld [vmem:[%s964_s0 + $0x58] sm:$0x3f] }
  0x22   :  { %330 = vrot.lane.b32.xlu1 %v276_v12, %s704_s22  ;;  %328 = vrot.lane.b32.xlu0 %v275_v13, %s704_s22 }
  0x23   :  { %54 = vrot.lane.b32.xlu2 %v26_v14, %s703_s13 }
  0x2a   :  { %86 = vrot.lane.b32.xlu0 %v34_v15, %s704_s22  ;;  %46 = vrot.lane.b32.xlu1 %v22_v16, %s703_s13 }
  0x2b   :  { %78 = vrot.lane.b32.xlu2 %v30_v17, %s704_s22 }
  0x32   :  { %300 = vrot.lane.b32.xlu0 %v269_v18, %s703_s13  ;;  %332 = vrot.lane.b32.xlu1 %v277_v19, %s704_s22 }
  0x33   :  { %56 = vrot.lane.b32.xlu2 %v27_v20, %s703_s13 }
  0x3a   :  { %88 = vrot.lane.b32.xlu0 %v35_v21, %s704_s22  ;;  %48 = vrot.lane.b32.xlu1 %v23_v22, %s703_s13 }
  0x3b   :  { %80 = vrot.lane.b32.xlu2 %v31_v23, %s704_s22  ;;  %v18_v23 = vld [vmem:[%s964_s0 + $0x40] sm:$0xff] }
  0x42   :  { %58 = vrot.lane.b32.xlu0 %v28_v24, %s703_s13  ;;  %90 = vrot.lane.b32.xlu1 %v36_v25, %s704_s22  ;;  %v14_v25 = vld [vmem:[%s964_s0] sm:$0xff] }
  0x43   :  { %50 = vrot.lane.b32.xlu2 %v24_v26, %s703_s13 }
  0x4a   :  { %82 = vrot.lane.b32.xlu0 %v32_v27, %s704_s22  ;;  %60 = vrot.lane.b32.xlu1 %v29_v28, %s703_s13 }
  0x4b   :  { %92 = vrot.lane.b32.xlu2 %v37_v29, %s704_s22 }
  0x52   :  { %52 = vrot.lane.b32.xlu0 %v25_v30, %s703_s13  ;;  %84 = vrot.lane.b32.xlu1 %v33_v31, %s704_s22 }
  0x5d   :  { %v291_v32 = vpop.permute.xlu2 %290 }
  0x5e   :  { %v344_v34 = vsel %vm102_vm0, %v256_v33, %v291_v32 }
  0x65   :  { %v323_v35 = vpop.permute.xlu2 %322 }
  0x66   :  { %v352_v36 = vsel %vm111_vm1, %v344_v34, %v323_v35  ;;  %v261_v35 = vld [vmem:[%s964_s0 + $0x78] sm:$0x3f] }
  0x67   :  { %v370_v37 = vrot.slane %v352_v36, 2  ;;  %394 = vst [vmem:[#allocation1 + $0x22] ss:$4 sm:$0xff] %v352_v36  ;;  %v371_v2 = vrot.slane %v352_v36, 4 }
  0x69   :  { %396 = vst [vmem:[#allocation1 + $0x23] ss:$4 sm:$0xff] %v370_v37 }
  0x6d   :  { %v295_v42 = vpop.permute.xlu2 %294 }
  0x6e   :  { %v346_v57 = vsel %vm102_vm0, %v258_v51, %v295_v42  ;;  %v19_v42 = vld [vmem:[%s964_s0 + $0x50] sm:$0xff] }
  0x74   :  { %v289_v40 = vpop.permute.xlu1 %288  ;;  %v287_v41 = vpop.permute.xlu0 %286 }
  0x75   :  { %v343_v45 = vsel %vm102_vm0, %v255_v43, %v289_v40  ;;  %v342_v46 = vsel %vm102_vm0, %v254_v44, %v287_v41  ;;  %v327_v56 = vpop.permute.xlu2 %326 }
  0x76   :  { %v354_v59 = vsel %vm111_vm1, %v346_v57, %v327_v56 }
  0x77   :  { %v374_v0 = vrot.slane %v354_v59, 2  ;;  %v375_v7 = vrot.slane %v354_v59, 4 }
  0x7c   :  { %v321_v47 = vpop.permute.xlu1 %320  ;;  %v319_v48 = vpop.permute.xlu0 %318 }
  0x7d   :  { %v351_v49 = vsel %vm111_vm1, %v343_v45, %v321_v47  ;;  %v350_v50 = vsel %vm111_vm1, %v342_v46, %v319_v48  ;;  %v55_v4 = vpop.permute.xlu2 %54  ;;  %v15_v45 = vld [vmem:[%s964_s0 + $0x10] sm:$0xff] }
  0x7e   :  { %v368_v52 = vrot.slane %v351_v49, 2  ;;  %v369_v53 = vrot.slane %v351_v49, 4  ;;  %388 = vst [vmem:[#allocation1 + $0x3] ss:$4 sm:$0xff] %v351_v49  ;;  %v366_v54 = vrot.slane %v350_v50, 2  ;;  %v367_v55 = vrot.slane %v350_v50, 4 }
  0x7f   :  { %382 = vst [vmem:[#allocation1] ss:$4 sm:$0xff] %v350_v50  ;;  %v107_v24 = vsel %vm102_vm0, %v18_v23, %v55_v4 }
  0x80   :  { %390 = vst [vmem:[#allocation1 + $0x20] ss:$4 sm:$0xff] %v368_v52 }
  0x81   :  { %392 = vst [vmem:[#allocation1 + $0x21] ss:$4 sm:$0xff] %v369_v53  ;;  %v20_v53 = vld [vmem:[%s964_s0 + $0x60] sm:$0xff] }
  0x82   :  { %384 = vst [vmem:[#allocation1 + $0x1] ss:$4 sm:$0xff] %v366_v54 }
  0x83   :  { %386 = vst [vmem:[#allocation1 + $0x2] ss:$4 sm:$0xff] %v367_v55 }
  0x84   :  { %v325_v60 = vpop.permute.xlu1 %324  ;;  %v293_v61 = vpop.permute.xlu0 %292 }
  0x85   :  { %v345_v62 = vsel %vm102_vm0, %v257_v58, %v293_v61  ;;  %v79_v12 = vpop.permute.xlu2 %78  ;;  %v16_v58 = vld [vmem:[%s964_s0 + $0x20] sm:$0xff] }
  0x86   :  { %v353_v63 = vsel %vm111_vm1, %v345_v62, %v325_v60  ;;  %v21_v60 = vld [vmem:[%s964_s0 + $0x70] sm:$0xff] }
  0x87   :  { %v373_v3 = vrot.slane %v353_v63, 4  ;;  %v372_v6 = vrot.slane %v353_v63, 2 }
  0x88   :  { %v398_v1 = vld.sshfl [vmem:[#allocation1 + $0x20] sm:$0xff pattern:$0x73625140] }
  0x89   :  { %403 = vst [vmem:[#allocation1 + $0x20] ss:$4 sm:$0xff] %v354_v59 }
  0x8a   :  { %v397_v5 = vld.sshfl [vmem:[#allocation1] sm:$0xff pattern:$0x73625140]  ;;  %404 = vst [vmem:[#allocation1 + $0x21] ss:$4 sm:$0xff] %v374_v0 }
  0x8b   :  { %399 = vst [vmem:[#allocation1] ss:$4 sm:$0xff] %v371_v2  ;;  %664 = vmatmul.msk.f32.vlgmr.msra.gmra.mxu1 %vm120_vm3, %v397_v5 }
  0x8c   :  { %400 = vst [vmem:[#allocation1 + $0x1] ss:$4 sm:$0xff] %v353_v63  ;;  %v299_v8 = vpop.permute.xlu1 %298  ;;  %v297_v9 = vpop.permute.xlu0 %296 }
  0x8d   :  { %402 = vst [vmem:[#allocation1 + $0x3] ss:$4 sm:$0xff] %v373_v3  ;;  %v348_v13 = vsel %vm102_vm0, %v260_v10, %v299_v8  ;;  %v347_v14 = vsel %vm102_vm0, %v259_v11, %v297_v9  ;;  %v57_v31 = vpop.permute.xlu2 %56  ;;  %v17_v3 = vld [vmem:[%s964_s0 + $0x30] sm:$0xff]  ;;  %s705_s0 = smov [#allocation2]  }
  0x8e   :  { %401 = vst [vmem:[#allocation1 + $0x2] ss:$4 sm:$0xff] %v372_v6  ;;  %v108_v44 = vsel %vm102_vm0, %v19_v42, %v57_v31  ;;  %s643_s28 = sshll.u32 %s705_s0, 4  ;;  %s644_s28 = int_to_ptr.vmem [resolvable:$true] %s643_s28 }
  0x8f   :  { %405 = vst [vmem:[#allocation1 + $0x22] ss:$4 sm:$0xff] %v375_v7 }
  0x93   :  { %665 = vmatmul.msk.f32.gmra.mxu1 %vm120_vm3, %v398_v1 }
  0x94   :  { %v331_v15 = vpop.permute.xlu1 %330  ;;  %v329_v16 = vpop.permute.xlu0 %328 }
  0x95   :  { %v356_v17 = vsel %vm111_vm1, %v348_v13, %v331_v15  ;;  %v407_v18 = vld.sshfl [vmem:[#allocation1] sm:$0xff pattern:$0x73625140]  ;;  %v355_v19 = vsel %vm111_vm1, %v347_v14, %v329_v16  ;;  %v81_v43 = vpop.permute.xlu2 %80 }
  0x96   :  { %v378_v20 = vrot.slane %v356_v17, 2  ;;  %411 = vst [vmem:[#allocation1 + $0x2] ss:$4 sm:$0xff] %v356_v17  ;;  %v376_v21 = vrot.slane %v355_v19, 2  ;;  %v377_v22 = vrot.slane %v355_v19, 4  ;;  %v379_v28 = vrot.slane %v356_v17, 4 }
  0x97   :  { %406 = vst [vmem:[#allocation1 + $0x23] ss:$4 sm:$0xff] %v355_v19 }
  0x98   :  { %412 = vst [vmem:[#allocation1 + $0x3] ss:$4 sm:$0xff] %v378_v20 }
  0x99   :  { %409 = vst [vmem:[#allocation1] ss:$4 sm:$0xff] %v376_v21 }
  0x9a   :  { %410 = vst [vmem:[#allocation1 + $0x1] ss:$4 sm:$0xff] %v377_v22 }
  0x9b   :  { %666 = vmatmul.msk.f32.gmra.mxu1 %vm120_vm3, %v407_v18 }
  0x9c   :  { %v87_v26 = vpop.permute.xlu0 %86  ;;  %v47_v27 = vpop.permute.xlu1 %46 }
  0x9d   :  { %v103_v29 = vsel %vm102_vm0, %v14_v25, %v47_v27  ;;  %v116_v30 = vsel %vm111_vm1, %v107_v24, %v87_v26  ;;  %v51_v52 = vpop.permute.xlu2 %50 }
  0x9e   :  { %v408_v32 = vld.sshfl [vmem:[#allocation1 + $0x20] sm:$0xff pattern:$0x73625140]  ;;  %659 = vmatmul.msk.f32.vlgmr.msra.gmra.mxu2 %vm120_vm3, %v116_v30  ;;  %v112_v33 = vsel %vm111_vm1, %v103_v29, %v79_v12  ;;  %v105_v59 = vsel %vm102_vm0, %v16_v58, %v51_v52 }
  0x9f   :  { %413 = vst [vmem:[#allocation1 + $0x20] ss:$4 sm:$0xff] %v379_v28  ;;  %655 = vmatmul.msk.f32.vlgmr.msra.gmra.mxu0 %vm120_vm3, %v112_v33 }
  0xa1   :  { %v417_v34 = vld.sshfl [vmem:[#allocation1] sm:$0xff pattern:$0x73625140] }
  0xa2   :  { %668 = vmatmul.msk.f32.vlgmr.msra.gmra.mxu3 %vm120_vm3, %v417_v34 }
  0xa3   :  { %667 = vmatmul.msk.f32.gmra.mxu1 %vm120_vm3, %v408_v32 }
  0xa4   :  { %v301_v36 = vpop.permute.xlu0 %300  ;;  %v333_v37 = vpop.permute.xlu1 %332 }
  0xa5   :  { %v349_v38 = vsel %vm102_vm0, %v261_v35, %v301_v36  ;;  %v93_v61 = vpop.permute.xlu2 %92 }
  0xa6   :  { %v357_v39 = vsel %vm111_vm1, %v349_v38, %v333_v37 }
  0xa7   :  { %v380_v40 = vrot.slane %v357_v39, 2  ;;  %v381_v41 = vrot.slane %v357_v39, 4  ;;  %414 = vst [vmem:[#allocation1 + $0x21] ss:$4 sm:$0xff] %v357_v39 }
  0xa9   :  { %415 = vst [vmem:[#allocation1 + $0x22] ss:$4 sm:$0xff] %v380_v40 }
  0xaa   :  { %416 = vst [vmem:[#allocation1 + $0x23] ss:$4 sm:$0xff] %v381_v41 }
  0xac   :  { %v89_v46 = vpop.permute.xlu0 %88  ;;  %v49_v47 = vpop.permute.xlu1 %48 }
  0xad   :  { %v104_v48 = vsel %vm102_vm0, %v15_v45, %v49_v47  ;;  %v117_v49 = vsel %vm111_vm1, %v108_v44, %v89_v46 }
  0xae   :  { %660 = vmatmul.msk.f32.gmra.mxu2 %vm120_vm3, %v117_v49  ;;  %v113_v50 = vsel %vm111_vm1, %v104_v48, %v81_v43 }
  0xaf   :  { %656 = vmatmul.msk.f32.gmra.mxu0 %vm120_vm3, %v113_v50 }
  0xb1   :  { %v418_v51 = vld.sshfl [vmem:[#allocation1 + $0x20] sm:$0xff pattern:$0x73625140] }
  0xb2   :  { %669 = vmatmul.msk.f32.gmra.mxu3 %vm120_vm3, %v418_v51 }
  0xb4   :  { %v59_v54 = vpop.permute.xlu0 %58  ;;  %v91_v55 = vpop.permute.xlu1 %90 }
  0xb5   :  { %v109_v56 = vsel %vm102_vm0, %v20_v53, %v59_v54 }
  0xb6   :  { %v118_v57 = vsel %vm111_vm1, %v109_v56, %v91_v55 }
  0xb7   :  { %661 = vmatmul.msk.f32.gmra.mxu2 %vm120_vm3, %v118_v57 }
  0xbc   :  { %v83_v62 = vpop.permute.xlu0 %82  ;;  %v61_v63 = vpop.permute.xlu1 %60 }
  0xbd   :  { %v110_v0 = vsel %vm102_vm0, %v21_v60, %v61_v63  ;;  %v114_v1 = vsel %vm111_vm1, %v105_v59, %v83_v62 }
  0xbe   :  { %657 = vmatmul.msk.f32.gmra.mxu0 %vm120_vm3, %v114_v1  ;;  %v119_v2 = vsel %vm111_vm1, %v110_v0, %v93_v61 }
  0xbf   :  { %662 = vmatmul.msk.f32.gmra.mxu2 %vm120_vm3, %v119_v2 }
  0xc4   :  { %v53_v4 = vpop.permute.xlu0 %52  ;;  %v85_v5 = vpop.permute.xlu1 %84 }
  0xc5   :  { %v106_v6 = vsel %vm102_vm0, %v17_v3, %v53_v4 }
  0xc6   :  { %v115_v7 = vsel %vm111_vm1, %v106_v6, %v85_v5 }
  0xc7   :  { %658 = vmatmul.msk.f32.gmra.mxu0 %vm120_vm3, %v115_v7 }
 0x108   :  { %v448_v8 = vpop.f32.mrf.mxu1 }
 0x109   :  { %v466_v9 = vmax.f32 %v448_v8, 0.0 }
 0x10b   :  { %v478_v10 = vrot.slane %v466_v9, 2  ;;  %v479_v11 = vrot.slane %v466_v9, 4  ;;  %v480_v12 = vrot.slane %v466_v9, 6  ;;  %496 = vst [vmem:[#allocation1] ss:$4 sm:$0xff] %v466_v9 }
 0x10d   :  { %498 = vst [vmem:[#allocation1 + $0x1] ss:$4 sm:$0xff] %v478_v10 }
 0x10e   :  { %500 = vst [vmem:[#allocation1 + $0x2] ss:$4 sm:$0xff] %v479_v11 }
 0x10f   :  { %503 = vst [vmem:[#allocation1 + $0x20] ss:$4 sm:$0xff] %v480_v12 }
 0x110   :  { %v451_v13 = vpop.f32.mrf.mxu1 }
 0x111   :  { %v467_v14 = vmax.f32 %v451_v13, 0.0 }
 0x113   :  { %v481_v15 = vrot.slane %v467_v14, 2  ;;  %v482_v16 = vrot.slane %v467_v14, 4  ;;  %v483_v17 = vrot.slane %v467_v14, 6  ;;  %505 = vst [vmem:[#allocation1 + $0x21] ss:$4 sm:$0xff] %v467_v14 }
 0x115   :  { %v501_v18 = vld.sshfl [vmem:[#allocation1] sm:$0xff pattern:$0x73625140]  ;;  %507 = vst [vmem:[#allocation1 + $0x22] ss:$4 sm:$0xff] %v481_v15 }
 0x116   :  { %509 = vst [vmem:[#allocation1] ss:$4 sm:$0xff] %v482_v16  ;;  %v542_v35 = vsel %vm541_vm4, %v501_v18, 0.0 }
 0x117   :  { %510 = vst [vmem:[#allocation1 + $0x1] ss:$4 sm:$0xff] %v483_v17  ;;  %v543_v38 = vrot.slane %v542_v35, 4 }
 0x118   :  { %v454_v19 = vpop.f32.mrf.mxu1 }
 0x119   :  { %v468_v20 = vmax.f32 %v454_v19, 0.0  ;;  %v544_v44 = vadd.f32 %v543_v38, %v542_v35 }
 0x11b   :  { %v484_v21 = vrot.slane %v468_v20, 2  ;;  %v485_v22 = vrot.slane %v468_v20, 4  ;;  %v486_v23 = vrot.slane %v468_v20, 6  ;;  %511 = vst [vmem:[#allocation1 + $0x2] ss:$4 sm:$0xff] %v468_v20  ;;  %v545_v50 = vrot.slane %v544_v44, 2 }
 0x11c   :  { %v508_v24 = vld.sshfl [vmem:[#allocation1 + $0x20] sm:$0xff pattern:$0x73625140]  ;;  %v166_v34 = vpop.f32.mrf.mxu0 }
 0x11d   :  { %513 = vst [vmem:[#allocation1 + $0x20] ss:$4 sm:$0xff] %v484_v21  ;;  %v190_v40 = vmax.f32 %v166_v34, 0.0  ;;  %v549_v43 = vsel %vm541_vm4, %v508_v24, 0.0  ;;  %v546_v57 = vadd.f32 %v545_v50, %v544_v44 }
 0x11e   :  { %514 = vst [vmem:[#allocation1 + $0x21] ss:$4 sm:$0xff] %v485_v22  ;;  %v550_v47 = vrot.slane %v549_v43, 4 }
 0x11f   :  { %515 = vst [vmem:[#allocation1 + $0x22] ss:$4 sm:$0xff] %v486_v23  ;;  %v198_v46 = vrot.slane %v190_v40, 4  ;;  %v547_v8 = vrot.slane %v546_v57, 1 }
 0x120   :  { %v457_v25 = vpop.f32.mrf.mxu1  ;;  %v551_v53 = vadd.f32 %v550_v47, %v549_v43 }
 0x121   :  { %v469_v26 = vmax.f32 %v457_v25, 0.0  ;;  %v178_v37 = vpop.f32.mrf.mxu2  ;;  %v199_v52 = vadd.f32 %v198_v46, %v190_v40  ;;  %v955_v23 = vadd.f32 %v547_v8, %v546_v57 }
 0x122   :  { %v512_v27 = vld.sshfl [vmem:[#allocation1] sm:$0xff pattern:$0x73625140]  ;;  %v194_v58 = vmax.f32 %v178_v37, 0.0  ;;  %v552_v3 = vrot.slane %v551_v53, 2 }
 0x123   :  { %v487_v28 = vrot.slane %v469_v26, 2  ;;  %v488_v29 = vrot.slane %v469_v26, 4  ;;  %v489_v30 = vrot.slane %v469_v26, 6  ;;  %517 = vst [vmem:[#allocation1] ss:$4 sm:$0xff] %v469_v26  ;;  %v556_v51 = vsel %vm541_vm4, %v512_v27, 0.0 }
 0x124   :  { %v557_v61 = vrot.slane %v556_v51, 4  ;;  %v200_v2 = vrot.slane %v199_v52, 2  ;;  %v222_v9 = vrot.slane %v194_v58, 4  ;;  %v553_v17 = vadd.f32 %v552_v3, %v551_v53 }
 0x125   :  { %518 = vst [vmem:[#allocation1 + $0x1] ss:$4 sm:$0xff] %v487_v28  ;;  %v460_v31 = vpop.f32.mrf.mxu3 }
 0x126   :  { %v516_v32 = vld.sshfl [vmem:[#allocation1 + $0x20] sm:$0xff pattern:$0x73625140]  ;;  %519 = vst [vmem:[#allocation1 + $0x2] ss:$4 sm:$0xff] %v488_v29  ;;  %v470_v33 = vmax.f32 %v460_v31, 0.0  ;;  %v558_v15 = vadd.f32 %v557_v61, %v556_v51  ;;  %v201_v16 = vadd.f32 %v200_v2, %v199_v52  ;;  %v223_v24 = vadd.f32 %v222_v9, %v194_v58 }
 0x127   :  { %521 = vst [vmem:[#allocation1 + $0x20] ss:$4 sm:$0xff] %v489_v30  ;;  %v563_v7 = vsel %vm541_vm4, %v516_v32, 0.0  ;;  %v554_v32 = vrot.slane %v553_v17, 1 }
 0x128   :  { %v490_v36 = vrot.slane %v470_v33, 2  ;;  %522 = vst [vmem:[#allocation1 + $0x21] ss:$4 sm:$0xff] %v470_v33  ;;  %v491_v39 = vrot.slane %v470_v33, 4  ;;  %v492_v42 = vrot.slane %v470_v33, 6  ;;  %v564_v18 = vrot.slane %v563_v7, 4 }
 0x129   :  { %v559_v30 = vrot.slane %v558_v15, 2  ;;  %v202_v31 = vrot.slane %v201_v16, 1  ;;  %v224_v40 = vrot.slane %v223_v24, 2 }
 0x12a   :  { %523 = vst [vmem:[#allocation1 + $0x22] ss:$4 sm:$0xff] %v490_v36  ;;  %v565_v34 = vadd.f32 %v564_v18, %v563_v7 }
 0x12b   :  { %v560_v47 = vadd.f32 %v559_v30, %v558_v15 }
 0x12c   :  { %v169_v45 = vpop.f32.mrf.mxu0  ;;  %v566_v53 = vrot.slane %v565_v34, 2 }
 0x12d   :  { %v520_v41 = vld.sshfl [vmem:[#allocation1] sm:$0xff pattern:$0x73625140]  ;;  %v191_v49 = vmax.f32 %v169_v45, 0.0 }
 0x12e   :  { %525 = vst [vmem:[#allocation1] ss:$4 sm:$0xff] %v491_v39  ;;  %v570_v59 = vsel %vm541_vm4, %v520_v41, 0.0 }
 0x12f   :  { %526 = vst [vmem:[#allocation1 + $0x1] ss:$4 sm:$0xff] %v492_v42  ;;  %v204_v55 = vrot.slane %v191_v49, 4  ;;  %v571_v4 = vrot.slane %v570_v59, 4 }
 0x131   :  { %v181_v48 = vpop.f32.mrf.mxu2  ;;  %v524_v60 = vld.sshfl [vmem:[#allocation1 + $0x20] sm:$0xff pattern:$0x73625140]  ;;  %v205_v5 = vadd.f32 %v204_v55, %v191_v49  ;;  %v572_v19 = vadd.f32 %v571_v4, %v570_v59 }
 0x132   :  { %v195_v62 = vmax.f32 %v181_v48, 0.0  ;;  %v577_v10 = vsel %vm541_vm4, %v524_v60, 0.0 }
 0x133   :  { %v206_v20 = vrot.slane %v205_v5, 2  ;;  %v578_v21 = vrot.slane %v577_v10, 4  ;;  %v573_v35 = vrot.slane %v572_v19, 2 }
 0x134   :  { %v228_v13 = vrot.slane %v195_v62, 4 }
 0x135   :  { %v463_v54 = vpop.f32.mrf.mxu3  ;;  %v207_v36 = vadd.f32 %v206_v20, %v205_v5  ;;  %v579_v37 = vadd.f32 %v578_v21, %v577_v10  ;;  %v567_v5 = vadd.f32 %v566_v53, %v565_v34 }
 0x136   :  { %v471_v56 = vmax.f32 %v463_v54, 0.0  ;;  %v229_v27 = vadd.f32 %v228_v13, %v195_v62  ;;  %v574_v54 = vadd.f32 %v573_v35, %v572_v19  ;;  %v225_v62 = vadd.f32 %v224_v40, %v223_v24 }
 0x137   :  { %v208_v55 = vrot.slane %v207_v36, 1  ;;  %v568_v24 = vrot.slane %v567_v5, 1 }
 0x138   :  { %v493_v63 = vrot.slane %v471_v56, 2  ;;  %v494_v0 = vrot.slane %v471_v56, 4  ;;  %v495_v1 = vrot.slane %v471_v56, 6  ;;  %527 = vst [vmem:[#allocation1 + $0x2] ss:$4 sm:$0xff] %v471_v56  ;;  %v230_v45 = vrot.slane %v229_v27, 2 }
 0x139   :  { %v580_v56 = vrot.slane %v579_v37, 2  ;;  %v209_v7 = vadd.f32 %v208_v55, %v207_v36  ;;  %v575_v10 = vrot.slane %v574_v54, 1  ;;  %v226_v20 = vrot.slane %v225_v62, 1 }
 0x13a   :  { %529 = vst [vmem:[#allocation1 + $0x20] ss:$4 sm:$0xff] %v493_v63  ;;  %v184_v6 = vpop.f32.mrf.mxu2  ;;  %v231_v63 = vadd.f32 %v230_v45, %v229_v27  ;;  %v569_v36 = vadd.f32 %v568_v24, %v567_v5 }
 0x13b   :  { %530 = vst [vmem:[#allocation1 + $0x21] ss:$4 sm:$0xff] %v494_v0  ;;  %v196_v11 = vmax.f32 %v184_v6, 0.0  ;;  %v172_v12 = vpop.f32.mrf.mxu0  ;;  %v561_v0 = vrot.slane %v560_v47, 1  ;;  %v203_v6 = vadd.f32 %v202_v31, %v201_v16  ;;  %v581_v8 = vadd.f32 %v580_v56, %v579_v37 }
 0x13c   :  { %531 = vst [vmem:[#allocation1 + $0x22] ss:$4 sm:$0xff] %v495_v1  ;;  %v192_v14 = vmax.f32 %v172_v12, 0.0  ;;  %v232_v15 = vrot.slane %v231_v63, 1 }
 0x13d   :  { %v234_v25 = vrot.slane %v196_v11, 4  ;;  %v598_v16 = vadd.f32 %v955_v23, %v203_v6 }
 0x13e   :  { %v210_v22 = vrot.slane %v192_v14, 4 }
 0x13f   :  { %v528_v26 = vld.sshfl [vmem:[#allocation1] sm:$0xff pattern:$0x73625140]  ;;  %v235_v41 = vadd.f32 %v234_v25, %v196_v11 }
 0x140   :  { %v584_v28 = vsel %vm541_vm4, %v528_v26, 0.0  ;;  %v211_v29 = vadd.f32 %v210_v22, %v192_v14  ;;  %v555_v14 = vadd.f32 %v554_v32, %v553_v17  ;;  %v562_v22 = vadd.f32 %v561_v0, %v560_v47 }
 0x141   :  { %v585_v33 = vrot.slane %v584_v28, 4  ;;  %v236_v58 = vrot.slane %v235_v41, 2  ;;  %v582_v26 = vrot.slane %v581_v8, 1  ;;  %v227_v17 = vadd.f32 %v226_v20, %v225_v62 }
 0x142   :  { %v212_v38 = vrot.slane %v211_v29, 2  ;;  %v187_v39 = vpop.f32.mrf.mxu2  ;;  %v599_v25 = vadd.f32 %v555_v14, %v209_v7 }
 0x143   :  { %v586_v42 = vadd.f32 %v585_v33, %v584_v28  ;;  %v197_v43 = vmax.f32 %v187_v39, 0.0  ;;  %v532_v44 = vld.sshfl [vmem:[#allocation1 + $0x20] sm:$0xff pattern:$0x73625140]  ;;  %v237_v11 = vadd.f32 %v236_v58, %v235_v41  ;;  %v233_v33 = vadd.f32 %v232_v15, %v231_v63 }
 0x144   :  { %v213_v46 = vadd.f32 %v212_v38, %v211_v29  ;;  %v591_v48 = vsel %vm541_vm4, %v532_v44, 0.0  ;;  %v175_v49 = vpop.f32.mrf.mxu0  ;;  %v576_v29 = vadd.f32 %v575_v10, %v574_v54  ;;  %v607_v37 = vmul.f32 0.071428575, %v599_v25 }
 0x145   :  { %v587_v50 = vrot.slane %v586_v42, 2  ;;  %v240_v51 = vrot.slane %v197_v43, 4  ;;  %v592_v52 = vrot.slane %v591_v48, 4  ;;  %v193_v57 = vmax.f32 %v175_v49, 0.0 }
 0x146   :  { %v214_v59 = vrot.slane %v213_v46, 1  ;;  %v238_v30 = vrot.slane %v237_v11, 1  ;;  %v583_v38 = vadd.f32 %v582_v26, %v581_v8  ;;  %v606_v41 = vmul.f32 0.071428575, %v598_v16 }
 0x147   :  { %v241_v60 = vadd.f32 %v240_v51, %v197_v43  ;;  %v593_v61 = vadd.f32 %v592_v52, %v591_v48  ;;  %v216_v1 = vrot.slane %v193_v57, 4  ;;  %v588_v2 = vadd.f32 %v587_v50, %v586_v42 }
 0x148   :  { %v215_v12 = vadd.f32 %v214_v59, %v213_v46  ;;  %v602_v42 = vadd.f32 %v576_v29, %v227_v17  ;;  %v239_v43 = vadd.f32 %v238_v30, %v237_v11  ;;  %v603_v45 = vadd.f32 %v583_v38, %v233_v33 }
 0x149   :  { %v242_v3 = vrot.slane %v241_v60, 2  ;;  %v594_v4 = vrot.slane %v593_v61, 2  ;;  %v217_v9 = vadd.f32 %v216_v1, %v193_v57  ;;  %v589_v21 = vrot.slane %v588_v2, 1 }
 0x14a   :  { %v600_v31 = vadd.f32 %v562_v22, %v215_v12  ;;  %v623_v48 = vsel %vm622_vm5, %v607_v37, %v606_v41  ;;  %v610_v51 = vmul.f32 0.071428575, %v602_v42  ;;  %v611_v53 = vmul.f32 0.071428575, %v603_v45 }
 0x14b   :  { %v243_v13 = vadd.f32 %v242_v3, %v241_v60  ;;  %v595_v18 = vadd.f32 %v594_v4, %v593_v61  ;;  %v218_v19 = vrot.slane %v217_v9, 2  ;;  %v590_v32 = vadd.f32 %v589_v21, %v588_v2 }
 0x14c   :  { %v608_v44 = vmul.f32 0.071428575, %v600_v31 }
 0x14d   :  { %v244_v27 = vrot.slane %v243_v13, 1  ;;  %v219_v28 = vadd.f32 %v218_v19, %v217_v9  ;;  %v596_v34 = vrot.slane %v595_v18, 1  ;;  %v604_v47 = vadd.f32 %v590_v32, %v239_v43 }
 0x14e   :  { %v625_v52 = vsel %vm624_vm6, %v608_v44, %v623_v48 }
 0x14f   :  { %v220_v35 = vrot.slane %v219_v28, 1  ;;  %v245_v39 = vadd.f32 %v244_v27, %v243_v13  ;;  %v597_v23 = vadd.f32 %v596_v34, %v595_v18  ;;  %v612_v55 = vmul.f32 0.071428575, %v604_v47 }
 0x151   :  { %v221_v40 = vadd.f32 %v220_v35, %v219_v28  ;;  %v605_v49 = vadd.f32 %v597_v23, %v245_v39 }
 0x153   :  { %v601_v46 = vadd.f32 %v569_v36, %v221_v40  ;;  %v613_v57 = vmul.f32 0.071428575, %v605_v49 }
 0x155   :  { %v609_v50 = vmul.f32 0.071428575, %v601_v46 }
 0x157   :  { %v627_v54 = vsel %vm626_vm7, %v609_v50, %v625_v52 }
 0x158   :  { %v629_v56 = vsel %vm628_vm8, %v610_v51, %v627_v54 }
 0x159   :  { %v631_v58 = vsel %vm630_vm9, %v611_v53, %v629_v56 }
 0x15a   :  { %v633_v59 = vsel %vm632_vm10, %v612_v55, %v631_v58 }
 0x15b   :  { %v635_v60 = vsel %vm634_vm11, %v613_v57, %v633_v59 }
 0x15c   :  { %637 = vst [vmem:[#allocation2] sm:$0xff] %v635_v60 }
 0x15d   :  { %648 = dma.vmem_to_hbm [thread:$0]  %s644_s28, 128, %s646_s1, [#allocation3]  }
 0x15e   :  { %701 = dma.done.wait [#allocation3], 128  }
 0x15f   :  { %702 = vsyncadd [#allocation3], 4294967168 }
 0x160   :  { %653 = vsyncpa [#allocation3], 1 }

</bundles_post_ra>
